<compile_context>
chip_gen: v5e
topology: v5e:2x2
jax: 0.10.0
libtpu: 0.0.40
codegen_flags: <defaults>
</compile_context>

<pallas_src>
import math
from functools import partial

import jax
import jax.numpy as jnp
import numpy as np
from jax.experimental import pallas as pl
from jax.experimental.pallas import tpu as pltpu


# ----------------------------- Pallas kernel --------------------------------
def _fbs_conv_kernel(p_ref, w_ref, b_ref, pi_ref, o_ref):
    # p_ref : (TILE_M, K)        bf16  im2col patch rows for this tile
    # w_ref : (K, Cout_pad)      bf16  fused (conv_w * bn_scale) weight
    # b_ref : (1, Cout_pad)      f32   fused bias (conv_b*scale + shift)
    # pi_ref: (1, Cout_pad)      f32   FBS channel gate for this batch element
    # o_ref : (TILE_M, Cout_pad) f32
    acc = jnp.dot(p_ref[...], w_ref[...], preferred_element_type=jnp.float32)
    y = (acc + b_ref[...]) * pi_ref[...]          # fused bias+BN, FBS gate
    o_ref[...] = jnp.maximum(y, 0.0).astype(o_ref.dtype)   # ReLU


def _fbs_conv_matmul(patches, w_fused, b_fused, pi_pad, *, tile_m=512):
    """patches (N, OHW, K) bf16; w (K, Cp) bf16; b (Cp,) f32; pi (N, Cp) f32."""
    N, OHW, K = patches.shape
    Cout_pad = w_fused.shape[1]

    # Row tile: big enough to amortize per-step overhead, multiple of 8 sublanes.
    tile_m = min(tile_m, pl.cdiv(OHW, 8) * 8)
    ohw_pad = pl.cdiv(OHW, tile_m) * tile_m
    if ohw_pad != OHW:
        patches = jnp.pad(patches, ((0, 0), (0, ohw_pad - OHW), (0, 0)))

    b2 = b_fused.reshape(1, Cout_pad).astype(jnp.float32)
    pi3 = pi_pad.reshape(N, 1, Cout_pad).astype(jnp.float32)

    grid = (N, ohw_pad // tile_m)
    out = pl.pallas_call(
        _fbs_conv_kernel,
        out_shape=jax.ShapeDtypeStruct((N, ohw_pad, Cout_pad), jnp.float32),
        grid_spec=pltpu.PrefetchScalarGridSpec(
            num_scalar_prefetch=0,
            grid=grid,
            in_specs=[
                pl.BlockSpec((pl.Squeezed(), tile_m, K), lambda n, t: (n, t, 0)),
                pl.BlockSpec((K, Cout_pad), lambda n, t: (0, 0)),
                pl.BlockSpec((1, Cout_pad), lambda n, t: (0, 0)),
                pl.BlockSpec((pl.Squeezed(), 1, Cout_pad), lambda n, t: (n, 0, 0)),
            ],
            out_specs=pl.BlockSpec(
                (pl.Squeezed(), tile_m, Cout_pad), lambda n, t: (n, t, 0)
            ),
        ),
        compiler_params=pltpu.CompilerParams(
            dimension_semantics=("parallel", "parallel")
        ),
    )(patches, w_fused, b2, pi3)
    return out[:, :OHW, :]


# ------------------------------ JAX glue -------------------------------------
def _im2col_nchw(x_nchw, kh, kw, stride, padding, dtype=jnp.bfloat16):
    """x: (N, Cin, H, W) -> patches (N, OH*OW, KH*KW*Cin) in `dtype`."""
    N, Cin, H, W = x_nchw.shape
    x = jnp.transpose(x_nchw, (0, 2, 3, 1)).astype(dtype)      # NHWC, bf16
    x = jnp.pad(x, ((0, 0), (padding, padding), (padding, padding), (0, 0)))
    OH = (H + 2 * padding - kh) // stride + 1
    OW = (W + 2 * padding - kw) // stride + 1
    cols = []
    for i in range(kh):
        for j in range(kw):
            cols.append(x[:, i:i + stride * OH:stride, j:j + stride * OW:stride, :])
    patches = jnp.stack(cols, axis=3)             # (N, OH, OW, KH*KW, Cin)
    patches = patches.reshape(N, OH * OW, kh * kw * Cin)
    return patches, OH, OW
    # TODO(synk): for production shapes, replace im2col (KH*KW x HBM blow-up)
    # with in-kernel shifted (OHW, Cin) x (Cin, Cout) matmuls over NHWC tiles.


def _winner_take_all(g, sparsity_ratio):
    """Zero out the (k-1) smallest entries per row, k = ceil((1-ratio)*C)."""
    if sparsity_ratio >= 1.0:
        return g
    N, C = g.shape
    k = math.ceil((1.0 - sparsity_ratio) * C)
    if k - 1 <= 0:
        return g
    _, inactive_idx = jax.lax.top_k(-g, k - 1)                 # (N, k-1)
    mask = jnp.ones_like(g)
    mask = mask.at[jnp.arange(N)[:, None], inactive_idx].set(0.0)
    return g * mask


def fbs_conv2d_forward(x, params, *, stride, padding, sparsity_ratio, inference=False):
    """FBSConv2d.fbs_forward. x: (N, Cin, H, W) f32. Returns (y_nchw, g_reduced)."""
    conv_w = params["conv_w"]          # (Cout, Cin, KH, KW)
    conv_b = params["conv_b"]          # (Cout,)
    pred_w = params["pred_w"]          # (Cout, Cin)
    pred_b = params["pred_b"]          # (Cout,)
    eps = 1e-5

    N, Cin, H, W = x.shape
    Cout, _, KH, KW = conv_w.shape

    # --- saliency path (tiny, plain JAX) ---
    ss = jnp.mean(x, axis=(-1, -2))                   # global_avgpool2d -> (N, Cin)
    g = ss @ pred_w.T + pred_b                        # Linear -> (N, Cout)
    pi = _winner_take_all(g, sparsity_ratio)          # (N, Cout)

    # With eval-mode (affine) BN the inference pre-mask (1 where pi!=0) folds
    # exactly into the post-mask multiply by pi, so one fused gate covers both.
    del inference
    # TODO(synk): training-mode BatchNorm (batch statistics) is not fused here;
    # this implements the eval-mode (running-stats) affine BN path.

    # --- fold conv bias + BN affine into the matmul weight / bias ---
    bn_scale = params["bn_gamma"] / jnp.sqrt(params["bn_var"] + eps)
    bn_shift = params["bn_beta"] - params["bn_mean"] * bn_scale
    # weight (Cout, Cin, KH, KW) -> (KH, KW, Cin, Cout) -> (K, Cout)
    w2d = jnp.transpose(conv_w, (2, 3, 1, 0)).reshape(KH * KW * Cin, Cout)
    w_fused = w2d * bn_scale[None, :]
    b_fused = conv_b * bn_scale + bn_shift

    # --- lane-dense padding of the output-channel dim to a multiple of 128 ---
    Cout_pad = max(128, pl.cdiv(Cout, 128) * 128)
    pad_c = Cout_pad - Cout
    w_fused = jnp.pad(w_fused, ((0, 0), (0, pad_c))).astype(jnp.bfloat16)
    b_fused = jnp.pad(b_fused, (0, pad_c))
    pi_pad = jnp.pad(pi, ((0, 0), (0, pad_c)))

    # --- conv-as-matmul + fused bias/BN + FBS gate + ReLU in Pallas ---
    patches, OH, OW = _im2col_nchw(x, KH, KW, stride, padding)  # bf16
    y = _fbs_conv_matmul(patches, w_fused, b_fused, pi_pad)     # (N, OHW, Cout_pad)
    y = y[:, :, :Cout].reshape(N, OH, OW, Cout)
    y = jnp.transpose(y, (0, 3, 1, 2))                          # back to NCHW

    g_red = jnp.mean(jnp.sum(g, axis=-1))
    return y, g_red


# ------------------------------ reference ------------------------------------
def _reference_forward(x, params, *, stride, padding, sparsity_ratio):
    """Pure-JAX f32 reference (eval-mode BN), for correctness check."""
    conv_w, conv_b = params["conv_w"], params["conv_b"]
    pred_w, pred_b = params["pred_w"], params["pred_b"]
    eps = 1e-5
    ss = jnp.mean(x, axis=(-1, -2))
    g = ss @ pred_w.T + pred_b
    pi = _winner_take_all(g, sparsity_ratio)
    y = jax.lax.conv_general_dilated(
        x, conv_w, window_strides=(stride, stride),
        padding=((padding, padding), (padding, padding)),
        dimension_numbers=("NCHW", "OIHW", "NCHW"))
    y = y + conv_b[None, :, None, None]
    scale = params["bn_gamma"] / jnp.sqrt(params["bn_var"] + eps)
    shift = params["bn_beta"] - params["bn_mean"] * scale
    y = y * scale[None, :, None, None] + shift[None, :, None, None]
    y = y * pi[:, :, None, None]
    y = jnp.maximum(y, 0.0)
    return y, jnp.mean(jnp.sum(g, axis=-1))


# -------------------------------- main ----------------------------------------
if __name__ == "__main__":
    N, Cin, H, W = 2, 4, 16, 16
    Cout, KH, KW = 8, 3, 3
    stride, padding = 1, 1
    sparsity_ratio = 0.5

    key = jax.random.PRNGKey(0)
    k1, k2, k3, k4 = jax.random.split(key, 4)

    params = {
        # conv weight/bias (deterministic synthetic init)
        "conv_w": 0.1 * jax.random.normal(k1, (Cout, Cin, KH, KW), jnp.float32),
        "conv_b": 0.05 * jax.random.normal(k2, (Cout,), jnp.float32),
        # channel saliency predictor: kaiming_normal_(fan_out, relu), bias = 1.0
        "pred_w": math.sqrt(2.0 / Cout)
        * jax.random.normal(k3, (Cout, Cin), jnp.float32),
        "pred_b": jnp.ones((Cout,), jnp.float32),
        # BatchNorm2d (eval-mode running stats; gamma frozen at 1 per FBS)
        "bn_gamma": jnp.ones((Cout,), jnp.float32),
        "bn_beta": jnp.zeros((Cout,), jnp.float32),
        "bn_mean": jnp.zeros((Cout,), jnp.float32),
        "bn_var": jnp.ones((Cout,), jnp.float32),
    }

    x = jax.random.normal(k4, (N, Cin, H, W), jnp.float32)

    fwd = jax.jit(
        partial(
            fbs_conv2d_forward,
            stride=stride,
            padding=padding,
            sparsity_ratio=sparsity_ratio,
        )
    )
    y, g_red = fwd(x, params)
    jax.block_until_ready((y, g_red))

    y_ref, g_ref = _reference_forward(
        x, params, stride=stride, padding=padding, sparsity_ratio=sparsity_ratio
    )
    # bf16 matmul operands (f32 accumulate) -> slightly relaxed tolerance.
    np.testing.assert_allclose(np.asarray(y), np.asarray(y_ref), rtol=2e-2, atol=2e-2)
    np.testing.assert_allclose(np.asarray(g_red), np.asarray(g_ref), rtol=1e-5, atol=1e-6)

    print("KERNEL_OK")
</pallas_src>

<mosaic_0001>
module attributes {stable_mosaic.version = 11 : i64} {
  func.func @_fbs_conv_kernel(%arg0: i32, %arg1: i32, %arg2: memref<1x256x36xbf16, #tpu.memory_space<vmem>>, %arg3: memref<36x128xbf16, #tpu.memory_space<vmem>>, %arg4: memref<1x128xf32, #tpu.memory_space<vmem>>, %arg5: memref<1x1x128xf32, #tpu.memory_space<vmem>>, %arg6: memref<1x256x128xf32, #tpu.memory_space<vmem>>) attributes {dimension_semantics = [#tpu.dimension_semantics<parallel>, #tpu.dimension_semantics<parallel>], iteration_bounds = array<i64: 2, 1>, scalar_prefetch = 0 : i64, scratch_operands = 0 : i64, tpu.core_type = #tpu.core_type<tc>, window_params = [{transform_indices = @transform_0, window_bounds = array<i64: 1, 256, 36>}, {pipeline_mode = #tpu.pipeline_mode<synchronous>, transform_indices = @transform_1, window_bounds = array<i64: 36, 128>}, {pipeline_mode = #tpu.pipeline_mode<synchronous>, transform_indices = @transform_2, window_bounds = array<i64: 1, 128>}, {transform_indices = @transform_3, window_bounds = array<i64: 1, 1, 128>}, {transform_indices = @transform_4, window_bounds = array<i64: 1, 256, 128>}]} {
    %c0 = arith.constant 0 : index
    %c0_0 = arith.constant 0 : index
    %c0_1 = arith.constant 0 : index
    %0 = vector.load %arg2[%c0, %c0_0, %c0_1] : memref<1x256x36xbf16, #tpu.memory_space<vmem>>, vector<1x256x36xbf16>
    %1 = vector.shape_cast %0 : vector<1x256x36xbf16> to vector<256x36xbf16>
    %c0_2 = arith.constant 0 : index
    %c0_3 = arith.constant 0 : index
    %2 = vector.load %arg3[%c0_2, %c0_3] : memref<36x128xbf16, #tpu.memory_space<vmem>>, vector<36x128xbf16>
    %cst = arith.constant dense<0.000000e+00> : vector<256x128xf32>
    %3 = tpu.matmul %1, %2, %cst {dimension_numbers = #tpu.dot_dimension_numbers<[1], [0], [0], [1], [0, 0, 1, 1], [], []>} : vector<256x36xbf16>, vector<36x128xbf16>, vector<256x128xf32> -> vector<256x128xf32>
    %c0_4 = arith.constant 0 : index
    %c0_5 = arith.constant 0 : index
    %4 = vector.load %arg4[%c0_4, %c0_5] : memref<1x128xf32, #tpu.memory_space<vmem>>, vector<1x128xf32>
    %5 = vector.broadcast %4 : vector<1x128xf32> to vector<256x128xf32>
    %6 = arith.addf %3, %5 : vector<256x128xf32>
    %c0_6 = arith.constant 0 : index
    %c0_7 = arith.constant 0 : index
    %c0_8 = arith.constant 0 : index
    %7 = vector.load %arg5[%c0_6, %c0_7, %c0_8] : memref<1x1x128xf32, #tpu.memory_space<vmem>>, vector<1x1x128xf32>
    %8 = vector.shape_cast %7 : vector<1x1x128xf32> to vector<1x128xf32>
    %9 = vector.broadcast %8 : vector<1x128xf32> to vector<256x128xf32>
    %10 = arith.mulf %6, %9 : vector<256x128xf32>
    %cst_9 = arith.constant 0.000000e+00 : f32
    %11 = vector.broadcast %cst_9 : f32 to vector<256x128xf32>
    %12 = arith.maximumf %10, %11 : vector<256x128xf32>
    %c0_10 = arith.constant 0 : index
    %c0_11 = arith.constant 0 : index
    %c0_12 = arith.constant 0 : index
    %13 = vector.load %arg6[%c0_10, %c0_11, %c0_12] : memref<1x256x128xf32, #tpu.memory_space<vmem>>, vector<1x256x128xf32>
    %14 = vector.shape_cast %13 : vector<1x256x128xf32> to vector<256x128xf32>
    %15 = vector.shape_cast %12 : vector<256x128xf32> to vector<1x256x128xf32>
    tpu.vector_store %arg6[%c0_10, %c0_11, %c0_12], %15 {strides = array<i32>} : memref<1x256x128xf32, #tpu.memory_space<vmem>>, vector<1x256x128xf32>,
    return
  }
  func.func @transform_0(%arg0: i32, %arg1: i32) -> (i32, i32, i32) {
    %c0_i32 = arith.constant 0 : i32
    %c0_i32_0 = arith.constant 0 : i32
    return %arg0, %arg1, %c0_i32 : i32, i32, i32
  }
  func.func @transform_1(%arg0: i32, %arg1: i32) -> (i32, i32) {
    %c0_i32 = arith.constant 0 : i32
    %c0_i32_0 = arith.constant 0 : i32
    %c0_i32_1 = arith.constant 0 : i32
    return %c0_i32, %c0_i32_0 : i32, i32
  }
  func.func @transform_2(%arg0: i32, %arg1: i32) -> (i32, i32) {
    %c0_i32 = arith.constant 0 : i32
    %c0_i32_0 = arith.constant 0 : i32
    %c0_i32_1 = arith.constant 0 : i32
    return %c0_i32, %c0_i32_0 : i32, i32
  }
  func.func @transform_3(%arg0: i32, %arg1: i32) -> (i32, i32, i32) {
    %c0_i32 = arith.constant 0 : i32
    %c0_i32_0 = arith.constant 0 : i32
    %c0_i32_1 = arith.constant 0 : i32
    return %arg0, %c0_i32, %c0_i32_0 : i32, i32, i32
  }
  func.func @transform_4(%arg0: i32, %arg1: i32) -> (i32, i32, i32) {
    %c0_i32 = arith.constant 0 : i32
    %c0_i32_0 = arith.constant 0 : i32
    return %arg0, %arg1, %c0_i32 : i32, i32, i32
  }
}

</mosaic_0001>

<bundles_post_ra>
// kernel: fbs_conv2d_forward.1
= control target key start
LH: loop header
LB: loop body
LE: loop exit
PB: predicated region body
PF: predicated region fallthrough
CT: control target
= control target key end

     0   :  { %s929_s15 = smov 0   ;;  %s931_s16 = smov 0   ;;  %s1123_s0 = inlined_call_operand.vmem [shape: bf16[2,256,36], index: 0, kind: input, shape index: {}]   ;;  %s1124_s1 = inlined_call_operand.vmem [shape: bf16[36,128], index: 1, kind: input, shape index: {}]   ;;  %s1125_s2 = inlined_call_operand.vmem [shape: f32[1,128], index: 2, kind: input, shape index: {}]   ;;  %s1126_s3 = inlined_call_operand.vmem [shape: f32[2,1,128], index: 3, kind: input, shape index: {}]   ;;  %s1127_s4 = inlined_call_operand.vmem [shape: f32[2,256,128], index: 4, kind: output, shape index: {}]  }
   0x1   :  { %s933_s17 = smov 0  }
   0x2 LB: > { %s26_s18 = sadd.s32 1, %s898_s16  ;;  %p730_p0 = scmp.ge.s32.totalorder %s902_s17, 1  ;;  %s902_s17 = sphi %s933_s17, %s14_s17   ;;  %s898_s16 = sphi %s931_s16, %s1129_s16   ;;  %s894_s15 = sphi %s929_s15, %s1128_s15  }
   0x3   : > { %p28_p1 = scmp.ge.s32.totalorder %s26_s18, 2  ;;  %p191_p2 = scmp.lt.s32.totalorder %s902_s17, 3 }
   0x5   : > { %s1131_s18 = smov (%p28_p1, %s26_s18), 0  ;;  %p192_p3 = pnand %p730_p0, %p191_p2 }
   0x6   : > { %p229_p4 = scmp.lt.s32.totalorder (!%p192_p3), %s894_s15, 1 }
   0x7   : > { %195 = sbr.rel (%p192_p3) target bundleno = 226 (0xe2), region = 36 }
   0xc   : > { %v288_v0 = vld [vmem:[%s1124_s1 + $0x10] sm:$0x3]  ;;  %vm437_vm0 = vcmask 1041408   ;;  %s1133_s15 = smov (!%p229_p4, %s894_s15), 1  ;;  %v844_v4 = vld [vmem:[%s1124_s1 + $0x8] sm:$0xff]  ;;  %v843_v5 = vld [vmem:[%s1124_s1] sm:$0xff] }
   0xd   : > { %v382_v1 = vunpack.c.l.b16 %v288_v0  ;;  %s240_s23 = scalar_lea.vmem %s1126_s3, %s1133_s15  ;;  %s825_s26 = sshll.u32 %s1133_s15, 7  ;;  %vm388_vm1 = vcmask 293888   ;;  %v1003_v22 = vld [vmem:[%s1125_s2] ss:$0 sm:$0xff] }
   0xe   : > { %s966_s5 = scalar_lea.vmem %s1123_s0, %s825_s26  ;;  %v1010_v23 = vld [vmem:[%s240_s23] ss:$0 sm:$0xff]  ;;  %s826_s10 = sshll.u32 %s1133_s15, 8 }
   0xf   : > { %v385_v2 = vpack.c.b16 %v382_v1, %v382_v1  ;;  %v827_v6 = vld [vmem:[%s966_s5] sm:$0xff]  ;;  %v828_v10 = vld [vmem:[%s966_s5 + $0x8] sm:$0xff]  ;;  %v829_v14 = vld [vmem:[%s966_s5 + $0x10] sm:$0xff]  ;;  %s1020_s13 = scalar_lea.vmem %s1127_s4, %s826_s10 }
  0x10   : > { %v831_v7 = vld [vmem:[%s966_s5 + $0x20] sm:$0xff]  ;;  %v832_v11 = vld [vmem:[%s966_s5 + $0x28] sm:$0xff]  ;;  %v833_v15 = vld [vmem:[%s966_s5 + $0x30] sm:$0xff] }
  0x11   : > { %v439_v3 = vsel %vm437_vm0, %v385_v2, 0  ;;  %v835_v8 = vld [vmem:[%s966_s5 + $0x40] sm:$0xff]  ;;  %v836_v12 = vld [vmem:[%s966_s5 + $0x48] sm:$0xff]  ;;  %v837_v16 = vld [vmem:[%s966_s5 + $0x50] sm:$0xff] }
  0x12   : > { %446 = vmatpush.bf16.msra.mxu0 %v439_v3  ;;  %845 = vmatpush.bf16.msra.mxu1 %v439_v3  ;;  %v839_v9 = vld [vmem:[%s966_s5 + $0x60] sm:$0xff]  ;;  %v840_v13 = vld [vmem:[%s966_s5 + $0x68] sm:$0xff]  ;;  %v841_v17 = vld [vmem:[%s966_s5 + $0x70] sm:$0xff] }
  0x13   : > { %846 = vmatpush.bf16.msra.mxu2 %v439_v3  ;;  %847 = vmatpush.bf16.msra.mxu3 %v439_v3  ;;  %v830_v18 = vld [vmem:[%s966_s5 + $0x18] sm:$0xff] }
  0x14   : > { %v834_v19 = vld [vmem:[%s966_s5 + $0x38] sm:$0xff] }
  0x15   : > { %v838_v20 = vld [vmem:[%s966_s5 + $0x58] sm:$0xff] }
  0x16   : > { %447 = vmatpush.bf16.msra.mxu0 %v844_v4  ;;  %848 = vmatpush.bf16.msra.mxu1 %v844_v4  ;;  %v842_v21 = vld [vmem:[%s966_s5 + $0x78] sm:$0xff] }
  0x17   : > { %849 = vmatpush.bf16.msra.mxu2 %v844_v4  ;;  %850 = vmatpush.bf16.msra.mxu3 %v844_v4 }
  0x1a   : > { %448 = vmatpush.bf16.msra.mxu0 %v843_v5  ;;  %851 = vmatpush.bf16.msra.mxu1 %v843_v5 }
  0x1b   : > { %852 = vmatpush.bf16.msra.mxu2 %v843_v5  ;;  %853 = vmatpush.bf16.msra.mxu3 %v843_v5 }
  0x1d   : > { %807 = vmatmul.msk.bf16.vlgmr.msra.gmra.mxu0 %vm388_vm1, %v827_v6  ;;  %811 = vmatmul.msk.bf16.vlgmr.msra.gmra.mxu1 %vm388_vm1, %v831_v7 }
  0x1e   : > { %815 = vmatmul.msk.bf16.vlgmr.msra.gmra.mxu2 %vm388_vm1, %v835_v8  ;;  %819 = vmatmul.msk.bf16.vlgmr.msra.gmra.mxu3 %vm388_vm1, %v839_v9 }
  0x2d   : > { %808 = vmatmul.msk.bf16.gmra.mxu0 %vm388_vm1, %v828_v10  ;;  %812 = vmatmul.msk.bf16.gmra.mxu1 %vm388_vm1, %v832_v11 }
  0x2e   : > { %816 = vmatmul.msk.bf16.gmra.mxu2 %vm388_vm1, %v836_v12  ;;  %820 = vmatmul.msk.bf16.gmra.mxu3 %vm388_vm1, %v840_v13 }
  0x3d   : > { %809 = vmatmul.msk.bf16.gmra.mxu0 %vm388_vm1, %v829_v14  ;;  %813 = vmatmul.msk.bf16.gmra.mxu1 %vm388_vm1, %v833_v15 }
  0x3e   : > { %817 = vmatmul.msk.bf16.gmra.mxu2 %vm388_vm1, %v837_v16  ;;  %821 = vmatmul.msk.bf16.gmra.mxu3 %vm388_vm1, %v841_v17 }
  0x4d   : > { %810 = vmatmul.msk.bf16.gmra.mxu0 %vm388_vm1, %v830_v18  ;;  %814 = vmatmul.msk.bf16.gmra.mxu1 %vm388_vm1, %v834_v19 }
  0x4e   : > { %818 = vmatmul.msk.bf16.gmra.mxu2 %vm388_vm1, %v838_v20  ;;  %822 = vmatmul.msk.bf16.gmra.mxu3 %vm388_vm1, %v842_v21 }
  0x9a   : > { %v450_v24 = vpop.f32.mrf.mxu0  ;;  %v470_v25 = vpop.f32.mrf.mxu1 }
  0x9b   : > { %v451_v26 = vadd.f32 %v1003_v22, %v450_v24  ;;  %v471_v27 = vadd.f32 %v1003_v22, %v470_v25 }
  0x9d   : > { %v534_v28 = vmul.f32 %v1010_v23, %v451_v26  ;;  %v542_v29 = vmul.f32 %v1010_v23, %v471_v27 }
  0x9f   : > { %v566_v30 = vmax.f32 %v534_v28, 0.0  ;;  %v574_v31 = vmax.f32 %v542_v29, 0.0 }
  0xa1   : > { %598 = vst [vmem:[%s1020_s13] sm:$0xff] %v566_v30  ;;  %v490_v32 = vpop.f32.mrf.mxu2  ;;  %v510_v33 = vpop.f32.mrf.mxu3 }
  0xa2   : > { %606 = vst [vmem:[%s1020_s13 + $0x40] sm:$0xff] %v574_v31  ;;  %v491_v34 = vadd.f32 %v1003_v22, %v490_v32  ;;  %v511_v35 = vadd.f32 %v1003_v22, %v510_v33  ;;  %v452_v36 = vpop.f32.mrf.mxu0  ;;  %v472_v37 = vpop.f32.mrf.mxu1 }
  0xa3   : > { %v453_v38 = vadd.f32 %v1003_v22, %v452_v36  ;;  %v473_v39 = vadd.f32 %v1003_v22, %v472_v37 }
  0xa4   : > { %v550_v40 = vmul.f32 %v1010_v23, %v491_v34  ;;  %v558_v41 = vmul.f32 %v1010_v23, %v511_v35 }
  0xa5   : > { %v535_v42 = vmul.f32 %v1010_v23, %v453_v38  ;;  %v543_v43 = vmul.f32 %v1010_v23, %v473_v39 }
  0xa6   : > { %v582_v44 = vmax.f32 %v550_v40, 0.0  ;;  %v590_v45 = vmax.f32 %v558_v41, 0.0 }
  0xa7   : > { %v567_v46 = vmax.f32 %v535_v42, 0.0  ;;  %v575_v47 = vmax.f32 %v543_v43, 0.0 }
  0xa8   : > { %614 = vst [vmem:[%s1020_s13 + $0x80] sm:$0xff] %v582_v44 }
  0xa9   : > { %622 = vst [vmem:[%s1020_s13 + $0xc0] sm:$0xff] %v590_v45  ;;  %v492_v48 = vpop.f32.mrf.mxu2  ;;  %v512_v49 = vpop.f32.mrf.mxu3 }
  0xaa   : > { %599 = vst [vmem:[%s1020_s13 + $0x8] sm:$0xff] %v567_v46  ;;  %v493_v50 = vadd.f32 %v1003_v22, %v492_v48  ;;  %v513_v51 = vadd.f32 %v1003_v22, %v512_v49  ;;  %v455_v52 = vpop.f32.mrf.mxu0  ;;  %v475_v53 = vpop.f32.mrf.mxu1 }
  0xab   : > { %607 = vst [vmem:[%s1020_s13 + $0x48] sm:$0xff] %v575_v47  ;;  %v456_v54 = vadd.f32 %v1003_v22, %v455_v52  ;;  %v476_v55 = vadd.f32 %v1003_v22, %v475_v53 }
  0xac   : > { %v551_v56 = vmul.f32 %v1010_v23, %v493_v50  ;;  %v559_v57 = vmul.f32 %v1010_v23, %v513_v51 }
  0xad   : > { %v536_v58 = vmul.f32 %v1010_v23, %v456_v54  ;;  %v544_v59 = vmul.f32 %v1010_v23, %v476_v55 }
  0xae   : > { %v583_v60 = vmax.f32 %v551_v56, 0.0  ;;  %v591_v61 = vmax.f32 %v559_v57, 0.0 }
  0xaf   : > { %v568_v62 = vmax.f32 %v536_v58, 0.0  ;;  %v576_v63 = vmax.f32 %v544_v59, 0.0 }
  0xb0   : > { %615 = vst [vmem:[%s1020_s13 + $0x88] sm:$0xff] %v583_v60 }
  0xb1   : > { %623 = vst [vmem:[%s1020_s13 + $0xc8] sm:$0xff] %v591_v61  ;;  %v495_v0 = vpop.f32.mrf.mxu2  ;;  %v515_v1 = vpop.f32.mrf.mxu3 }
  0xb2   : > { %600 = vst [vmem:[%s1020_s13 + $0x10] sm:$0xff] %v568_v62  ;;  %v496_v2 = vadd.f32 %v1003_v22, %v495_v0  ;;  %v516_v3 = vadd.f32 %v1003_v22, %v515_v1  ;;  %v457_v4 = vpop.f32.mrf.mxu0  ;;  %v477_v5 = vpop.f32.mrf.mxu1 }
  0xb3   : > { %608 = vst [vmem:[%s1020_s13 + $0x50] sm:$0xff] %v576_v63  ;;  %v458_v6 = vadd.f32 %v1003_v22, %v457_v4  ;;  %v478_v7 = vadd.f32 %v1003_v22, %v477_v5 }
  0xb4   : > { %v552_v8 = vmul.f32 %v1010_v23, %v496_v2  ;;  %v560_v9 = vmul.f32 %v1010_v23, %v516_v3 }
  0xb5   : > { %v537_v10 = vmul.f32 %v1010_v23, %v458_v6  ;;  %v545_v11 = vmul.f32 %v1010_v23, %v478_v7 }
  0xb6   : > { %v584_v12 = vmax.f32 %v552_v8, 0.0  ;;  %v592_v13 = vmax.f32 %v560_v9, 0.0 }
  0xb7   : > { %v569_v14 = vmax.f32 %v537_v10, 0.0  ;;  %v577_v15 = vmax.f32 %v545_v11, 0.0 }
  0xb8   : > { %616 = vst [vmem:[%s1020_s13 + $0x90] sm:$0xff] %v584_v12 }
  0xb9   : > { %624 = vst [vmem:[%s1020_s13 + $0xd0] sm:$0xff] %v592_v13  ;;  %v497_v16 = vpop.f32.mrf.mxu2  ;;  %v517_v17 = vpop.f32.mrf.mxu3 }
  0xba   : > { %601 = vst [vmem:[%s1020_s13 + $0x18] sm:$0xff] %v569_v14  ;;  %v498_v18 = vadd.f32 %v1003_v22, %v497_v16  ;;  %v518_v19 = vadd.f32 %v1003_v22, %v517_v17  ;;  %v460_v20 = vpop.f32.mrf.mxu0  ;;  %v480_v21 = vpop.f32.mrf.mxu1 }
  0xbb   : > { %609 = vst [vmem:[%s1020_s13 + $0x58] sm:$0xff] %v577_v15  ;;  %v461_v24 = vadd.f32 %v1003_v22, %v460_v20  ;;  %v481_v25 = vadd.f32 %v1003_v22, %v480_v21 }
  0xbc   : > { %v553_v26 = vmul.f32 %v1010_v23, %v498_v18  ;;  %v561_v27 = vmul.f32 %v1010_v23, %v518_v19 }
  0xbd   : > { %v538_v28 = vmul.f32 %v1010_v23, %v461_v24  ;;  %v546_v29 = vmul.f32 %v1010_v23, %v481_v25 }
  0xbe   : > { %v585_v30 = vmax.f32 %v553_v26, 0.0  ;;  %v593_v31 = vmax.f32 %v561_v27, 0.0 }
  0xbf   : > { %v570_v32 = vmax.f32 %v538_v28, 0.0  ;;  %v578_v33 = vmax.f32 %v546_v29, 0.0 }
  0xc0   : > { %617 = vst [vmem:[%s1020_s13 + $0x98] sm:$0xff] %v585_v30 }
  0xc1   : > { %625 = vst [vmem:[%s1020_s13 + $0xd8] sm:$0xff] %v593_v31  ;;  %v500_v34 = vpop.f32.mrf.mxu2  ;;  %v520_v35 = vpop.f32.mrf.mxu3 }
  0xc2   : > { %602 = vst [vmem:[%s1020_s13 + $0x20] sm:$0xff] %v570_v32  ;;  %v501_v36 = vadd.f32 %v1003_v22, %v500_v34  ;;  %v521_v37 = vadd.f32 %v1003_v22, %v520_v35  ;;  %v462_v38 = vpop.f32.mrf.mxu0  ;;  %v482_v39 = vpop.f32.mrf.mxu1 }
  0xc3   : > { %610 = vst [vmem:[%s1020_s13 + $0x60] sm:$0xff] %v578_v33  ;;  %v463_v40 = vadd.f32 %v1003_v22, %v462_v38  ;;  %v483_v41 = vadd.f32 %v1003_v22, %v482_v39 }
  0xc4   : > { %v554_v42 = vmul.f32 %v1010_v23, %v501_v36  ;;  %v562_v43 = vmul.f32 %v1010_v23, %v521_v37 }
  0xc5   : > { %v539_v44 = vmul.f32 %v1010_v23, %v463_v40  ;;  %v547_v45 = vmul.f32 %v1010_v23, %v483_v41 }
  0xc6   : > { %v586_v46 = vmax.f32 %v554_v42, 0.0  ;;  %v594_v47 = vmax.f32 %v562_v43, 0.0 }
  0xc7   : > { %v571_v48 = vmax.f32 %v539_v44, 0.0  ;;  %v579_v49 = vmax.f32 %v547_v45, 0.0 }
  0xc8   : > { %618 = vst [vmem:[%s1020_s13 + $0xa0] sm:$0xff] %v586_v46 }
  0xc9   : > { %626 = vst [vmem:[%s1020_s13 + $0xe0] sm:$0xff] %v594_v47  ;;  %v502_v50 = vpop.f32.mrf.mxu2  ;;  %v522_v51 = vpop.f32.mrf.mxu3 }
  0xca   : > { %603 = vst [vmem:[%s1020_s13 + $0x28] sm:$0xff] %v571_v48  ;;  %v503_v52 = vadd.f32 %v1003_v22, %v502_v50  ;;  %v523_v53 = vadd.f32 %v1003_v22, %v522_v51  ;;  %v465_v54 = vpop.f32.mrf.mxu0  ;;  %v485_v55 = vpop.f32.mrf.mxu1 }
  0xcb   : > { %611 = vst [vmem:[%s1020_s13 + $0x68] sm:$0xff] %v579_v49  ;;  %v466_v56 = vadd.f32 %v1003_v22, %v465_v54  ;;  %v486_v57 = vadd.f32 %v1003_v22, %v485_v55 }
  0xcc   : > { %v555_v58 = vmul.f32 %v1010_v23, %v503_v52  ;;  %v563_v59 = vmul.f32 %v1010_v23, %v523_v53 }
  0xcd   : > { %v540_v60 = vmul.f32 %v1010_v23, %v466_v56  ;;  %v548_v61 = vmul.f32 %v1010_v23, %v486_v57 }
  0xce   : > { %v587_v62 = vmax.f32 %v555_v58, 0.0  ;;  %v595_v63 = vmax.f32 %v563_v59, 0.0 }
  0xcf   : > { %v572_v0 = vmax.f32 %v540_v60, 0.0  ;;  %v580_v1 = vmax.f32 %v548_v61, 0.0 }
  0xd0   : > { %619 = vst [vmem:[%s1020_s13 + $0xa8] sm:$0xff] %v587_v62 }
  0xd1   : > { %627 = vst [vmem:[%s1020_s13 + $0xe8] sm:$0xff] %v595_v63  ;;  %v505_v2 = vpop.f32.mrf.mxu2  ;;  %v525_v3 = vpop.f32.mrf.mxu3 }
  0xd2   : > { %604 = vst [vmem:[%s1020_s13 + $0x30] sm:$0xff] %v572_v0  ;;  %v506_v4 = vadd.f32 %v1003_v22, %v505_v2  ;;  %v526_v5 = vadd.f32 %v1003_v22, %v525_v3  ;;  %v467_v6 = vpop.f32.mrf.mxu0  ;;  %v487_v7 = vpop.f32.mrf.mxu1 }
  0xd3   : > { %612 = vst [vmem:[%s1020_s13 + $0x70] sm:$0xff] %v580_v1  ;;  %v468_v8 = vadd.f32 %v1003_v22, %v467_v6  ;;  %v488_v9 = vadd.f32 %v1003_v22, %v487_v7 }
  0xd4   : > { %v556_v10 = vmul.f32 %v1010_v23, %v506_v4  ;;  %v564_v11 = vmul.f32 %v1010_v23, %v526_v5 }
  0xd5   : > { %v541_v12 = vmul.f32 %v1010_v23, %v468_v8  ;;  %v549_v13 = vmul.f32 %v1010_v23, %v488_v9 }
  0xd6   : > { %v588_v14 = vmax.f32 %v556_v10, 0.0  ;;  %v596_v15 = vmax.f32 %v564_v11, 0.0 }
  0xd7   : > { %v573_v16 = vmax.f32 %v541_v12, 0.0  ;;  %v581_v17 = vmax.f32 %v549_v13, 0.0 }
  0xd8   : > { %620 = vst [vmem:[%s1020_s13 + $0xb0] sm:$0xff] %v588_v14 }
  0xd9   : > { %628 = vst [vmem:[%s1020_s13 + $0xf0] sm:$0xff] %v596_v15  ;;  %v507_v18 = vpop.f32.mrf.mxu2  ;;  %v527_v19 = vpop.f32.mrf.mxu3 }
  0xda   : > { %605 = vst [vmem:[%s1020_s13 + $0x38] sm:$0xff] %v573_v16  ;;  %v508_v20 = vadd.f32 %v1003_v22, %v507_v18  ;;  %v528_v21 = vadd.f32 %v1003_v22, %v527_v19 }
  0xdb   : > { %613 = vst [vmem:[%s1020_s13 + $0x78] sm:$0xff] %v581_v17 }
  0xdc   : > { %v557_v24 = vmul.f32 %v1010_v23, %v508_v20  ;;  %v565_v25 = vmul.f32 %v1010_v23, %v528_v21 }
  0xde   : > { %v589_v26 = vmax.f32 %v557_v24, 0.0  ;;  %v597_v27 = vmax.f32 %v565_v25, 0.0 }
  0xe0   : > { %621 = vst [vmem:[%s1020_s13 + $0xb8] sm:$0xff] %v589_v26 }
  0xe1   : > { %629 = vst [vmem:[%s1020_s13 + $0xf8] sm:$0xff] %v597_v27 }
  0xe2 PF: > { %s14_s17 = sadd.s32 1, %s902_s17   ;;  %s1128_s15 = smov %s898_s16 }
  0xe3   : > { %p11_p5 = scmp.ge.s32.totalorder %s14_s17, 4   ;;  %s1129_s16 = smov %s1131_s18 }
  0xe5   :  { %13 = sbr.rel (!%p11_p5) target bundleno = 2 (0x2), region = 69 }

</bundles_post_ra>
